<compile_context>
chip_gen: v7x
topology: tpu7x:2x2x1
jax: 0.10.0
libtpu: 0.0.40
codegen_flags: <defaults>
</compile_context>

<pallas_src>
import functools

import jax
import jax.numpy as jnp
import numpy as np
from jax.experimental import pallas as pl
from jax.experimental.pallas import tpu as pltpu


# ----------------------------- Pallas kernel ------------------------------- #

def _make_shift_mac_kernel(shifts, lane_width):
    """out[r, l] = sum_t coef[t, l] * x[r, (l - shifts[t]) mod lane_width]."""
    shifts = tuple(int(s) % int(lane_width) for s in shifts)

    def kernel(coef_ref, x_ref, o_ref):
        x = x_ref[...]                                   # [TN, TL] lane-dense block
        coef = coef_ref[...]                             # [T,  TL] constants (resident)

        def term(t):
            s = shifts[t]
            v = x if s == 0 else pltpu.roll(x, s, 1)     # static lane rotation on the XLU
            # [1,TL]->[TN,TL] sublane broadcast on the VPU; kept instead of a stride-0 vld
            # because conv is XLU-bound / Fourier is HBM-bound, so this rides in VALU slack.
            return coef[t:t + 1, :] * v

        acc = term(0)                                    # first tap has shift 0: no roll, no zeros
        for t in range(1, len(shifts)):
            acc = acc + term(t)
        o_ref[...] = acc.astype(o_ref.dtype)

    return kernel


# ----------------------------- tiling heuristics ---------------------------- #

def _default_block_cap():
    """Per-chip block-byte cap: ~2 MiB on 64 MiB-VMEM parts (v7x), ~4 MiB otherwise (v5e/v6e)."""
    try:
        vmem = pltpu.get_tpu_info().vmem_capacity_bytes
    except Exception:
        vmem = 64 << 20
    return (4 << 20) if vmem >= (128 << 20) else (2 << 20)


def _largest_lane_tile(L, upper):
    """Largest multiple-of-128 divisor of L that is <= upper (0 if none)."""
    cand = min((upper // 128) * 128, (L // 128) * 128)
    while cand >= 128:
        if L % cand == 0:
            return cand
        cand -= 128
    return 0


def _choose_blocks(n_rows, L, *, allow_lane_split, max_block_bytes):
    """Pick (rows_per_block, lanes_per_block).  Rows are a multiple of 8 (sublane rule); the
    caller pads the row count up to a multiple, so the byte cap is honoured whenever possible
    (the only exception is a non-splittable branch whose single 8-row slab already exceeds it)."""
    TL = L
    if allow_lane_split and L % 128 == 0 and 8 * L * 4 > max_block_bytes:
        t = _largest_lane_tile(L, max(128, max_block_bytes // (8 * 4)))
        TL = t if t else 128
    cap_rows = max(8, (max_block_bytes // (TL * 4)) // 8 * 8)
    tgt_rows = max(8, (n_rows // 4) // 8 * 8)            # aim for >=4 row blocks (pipeline + 2 TCs)
    TN = min(cap_rows, tgt_rows)
    # Guarantee >=2 grid steps for the lane-splittable branch (both v7x TensorCores busy).
    row_blocks = -(-n_rows // TN)
    if allow_lane_split and L % 128 == 0 and row_blocks * (L // TL) < 2:
        t = _largest_lane_tile(L, L // 2)
        if t:
            TL = t
    return TN, TL


# ----------------------------- pallas_call wrapper -------------------------- #

def shift_mac(x, coef, shifts, *, allow_lane_split=False, max_block_bytes=None):
    """Run the shift-and-MAC kernel over rows of x ([N, L]) with coefficients coef ([T, L])."""
    N, L = x.shape
    T = coef.shape[0]
    if max_block_bytes is None:
        max_block_bytes = _default_block_cap()
    TN, TL = _choose_blocks(N, L, allow_lane_split=allow_lane_split,
                            max_block_bytes=max_block_bytes)

    n_pad = (-(-N // TN)) * TN                           # pad rows -> cap never silently exceeded
    xp = jnp.pad(x, ((0, n_pad - N), (0, 0))) if n_pad != N else x

    # Lane axis is the OUTER grid axis: the coefficient slice is only re-fetched when it changes.
    grid = (L // TL, n_pad // TN)

    block_bytes = TN * TL * 4
    coef_bytes = T * TL * 4
    vmem_needed = 8 * block_bytes + 2 * coef_bytes + (8 << 20)   # dbl-buffered in/out + temporaries
    vmem_limit = int(min(max(vmem_needed, 32 << 20), 64 << 20))

    out = pl.pallas_call(
        _make_shift_mac_kernel(shifts, TL),
        out_shape=jax.ShapeDtypeStruct((n_pad, L), jnp.float32),
        grid=grid,
        in_specs=[
            pl.BlockSpec((T, TL), lambda j, i: (0, j)),      # constants: fetched once per lane strip
            pl.BlockSpec((TN, TL), lambda j, i: (i, j)),
        ],
        out_specs=pl.BlockSpec((TN, TL), lambda j, i: (i, j)),
        compiler_params=pltpu.CompilerParams(
            dimension_semantics=("parallel", "parallel"),
            vmem_limit_bytes=vmem_limit,
        ),
    )(coef, xp)
    return out[:N] if n_pad != N else out


# ----------------------------- coefficient builders ------------------------ #

def _conv_coefficients(filter_kernel, H, W, zero_corner_taps=False):
    """Lane coefficients + raw shifts for the padding=1 3x3 cross-correlation applied to the
    real/imag planes of a [*, H, W, 2] tensor flattened to [*, H*W*2].  Zero padding is realized
    by zeroing the coefficient at out-of-image taps.  The shift-0 (center) tap comes first."""
    hi = jnp.arange(H)
    wi = jnp.arange(W)
    if zero_corner_taps:   # canonical 5-point sharpen: corners statically known to be zero
        offsets = [(0, 0), (-1, 0), (1, 0), (0, -1), (0, 1)]
    else:
        offsets = [(0, 0)] + [(dy, dx) for dy in (-1, 0, 1) for dx in (-1, 0, 1)
                              if (dy, dx) != (0, 0)]
    coefs, shifts = [], []
    for dy, dx in offsets:
        row_ok = (hi + dy >= 0) & (hi + dy < H)                           # [H]
        col_ok = (wi + dx >= 0) & (wi + dx < W)                           # [W]
        valid = (row_ok[:, None] & col_ok[None, :]).astype(jnp.float32)
        tap = filter_kernel[dy + 1, dx + 1]
        coefs.append((tap * valid).reshape(-1))                           # [H*W]
        shifts.append(-(dy * 2 * W + 2 * dx))                             # roll(x,s)[l] = x[l-s]
    coef = jnp.repeat(jnp.stack(coefs), 2, axis=1)                        # [T, L]: same for re/im
    return coef.astype(jnp.float32), shifts


def _fourier_coefficients(fft_kernel):
    """Lane coefficients + raw shifts for out = fft_kernel * (fr + i*fi) with (re, im) interleaved
    on the lane axis: out_even = kr*fr - ki*fi, out_odd = kr*fi + ki*fr.  Shift-0 tap first.
    The +-1 shifts have zero coefficient at the wrap position, so lane-tiling (even widths) is exact."""
    kr = jnp.real(fft_kernel).astype(jnp.float32).reshape(-1)             # [H*W]
    ki = jnp.imag(fft_kernel).astype(jnp.float32).reshape(-1)
    zeros = jnp.zeros_like(ki)
    c_same = jnp.repeat(kr, 2)                                            # kr * f[l]
    c_next = jnp.stack([-ki, zeros], axis=-1).reshape(-1)                 # (-ki) * f[l+1], even lanes
    c_prev = jnp.stack([zeros, ki], axis=-1).reshape(-1)                  # (+ki) * f[l-1], odd lanes
    coef = jnp.stack([c_same, c_next, c_prev])                            # [3, L]
    shifts = [0, -1, 1]
    return coef, shifts


# ----------------------------- forward pass -------------------------------- #

@functools.partial(jax.jit, static_argnums=(2, 3))
def sharpen_filter_forward(inputs, filter_kernel, image_size, zero_corner_taps=False):
    u = inputs['u_t']            # [B, H, W, 2]
    f = inputs['f']              # [B, C, H, W, 2]
    c = inputs['coil_sens']      # passed through
    m = inputs['sampling_mask']  # passed through

    B, H, W, _ = u.shape
    C = f.shape[1]
    L = H * W * 2

    # --- u branch: 3x3 sharpen conv (padding=1) on real & imag planes, padding fused in-kernel ---
    conv_coef, conv_shifts = _conv_coefficients(filter_kernel, H, W, zero_corner_taps)
    u_flat = u.reshape(B, L)                                              # free reshape
    out_u = shift_mac(u_flat, conv_coef, conv_shifts,
                      allow_lane_split=False)                             # lane split needs a halo here
    out_u = out_u.reshape(B, H, W, 2)[:, None]                            # [B,1,H,W,2]

    # --- f branch: elementwise complex multiply by fft2(zero-padded filter) ---
    # ZeroPad2d((0, image_size[0]-3, 0, image_size[1]-3)): pad right (width), then bottom (height).
    pad_right = int(image_size[0] - 3)
    pad_bottom = int(image_size[1] - 3)
    padded_filt = jnp.pad(filter_kernel, ((0, pad_bottom), (0, pad_right)))
    fft_kernel = jnp.fft.fft2(padded_filt)                                # tiny; plain-JAX glue
    assert fft_kernel.shape == (H, W), (
        f"image_size {image_size} is (width, height); fft kernel shape {fft_kernel.shape} "
        f"does not match f spatial dims {(H, W)}")

    cm_coef, cm_shifts = _fourier_coefficients(fft_kernel)
    f_flat = f.reshape(B * C, L)                                          # free reshape
    out_f = shift_mac(f_flat, cm_coef, cm_shifts, allow_lane_split=True)  # 2-axis grid, bounded blocks
    out_f = out_f.reshape(B, C, H, W, 2)[:, None]                         # [B,1,C,H,W,2]

    # Not fused into a single pallas_call: see header comment (would add an HBM concat/slice pass
    # over f or race under megacore parallel semantics).
    # TODO(synk): .grad masking (mask_sharpen_grad) is a backward-pass side effect; no forward equivalent.
    return {
        'u_t': out_u,
        'f': out_f,
        'coil_sens': c[:, None],
        'sampling_mask': m[:, None],
        'kernel': [filter_kernel],
    }


# ----------------------------- main ---------------------------------------- #

if __name__ == "__main__":
    B, C, H, W = 2, 4, 16, 16
    image_size = (W, H)          # module convention: (width, height)

    # Deterministic parameter init (same as nn.Parameter in __init__): 5-point sharpen stencil.
    filter_kernel = jnp.array([[0., -1., 0.],
                               [-1., 5., -1.],
                               [0., -1., 0.]], dtype=jnp.float32)

    key = jax.random.PRNGKey(0)
    k1, k2, k3, k4 = jax.random.split(key, 4)
    inputs = {
        'u_t': jax.random.normal(k1, (B, H, W, 2), jnp.float32),
        'f': jax.random.normal(k2, (B, C, H, W, 2), jnp.float32),
        'coil_sens': jax.random.normal(k3, (B, C, H, W, 2), jnp.float32),
        'sampling_mask': (jax.random.uniform(k4, (B, H, W)) > 0.5).astype(jnp.float32),
    }

    # Optimized path: corners of the canonical init are zero -> static 5-tap conv (4 rolls).
    out = sharpen_filter_forward(inputs, filter_kernel, image_size, True)
    out = jax.block_until_ready(out)
    # General learned-3x3 path (9 taps) for completeness.
    out_gen = sharpen_filter_forward(inputs, filter_kernel, image_size, False)
    out_gen = jax.block_until_ready(out_gen)

    # --- correctness check against plain-JAX reference ---
    u_planes = jnp.transpose(inputs['u_t'], (0, 3, 1, 2)).reshape(B * 2, H, W)
    ref_conv = jax.lax.conv_general_dilated(
        u_planes[:, None], filter_kernel[None, None], (1, 1), ((1, 1), (1, 1)),
        dimension_numbers=('NCHW', 'OIHW', 'NCHW'))[:, 0]
    ref_u = jnp.transpose(ref_conv.reshape(B, 2, H, W), (0, 2, 3, 1))[:, None]

    padded_filt = jnp.pad(filter_kernel, ((0, H - 3), (0, W - 3)))
    fk = jnp.fft.fft2(padded_filt)
    f_c = inputs['f'][..., 0] + 1j * inputs['f'][..., 1]
    ref_fc = fk[None, None] * f_c
    ref_f = jnp.stack([jnp.real(ref_fc), jnp.imag(ref_fc)], axis=-1)[:, None]

    for o in (out, out_gen):
        assert np.allclose(np.asarray(o['u_t']), np.asarray(ref_u), atol=1e-4), "u_t mismatch"
        assert np.allclose(np.asarray(o['f']), np.asarray(ref_f), atol=1e-3), "f mismatch"
        assert o['u_t'].shape == (B, 1, H, W, 2)
        assert o['f'].shape == (B, 1, C, H, W, 2)
        assert o['coil_sens'].shape == (B, 1, C, H, W, 2)
        assert o['sampling_mask'].shape == (B, 1, H, W)

    print("KERNEL_OK")
</pallas_src>

<mosaic_0001>
module attributes {stable_mosaic.version = 11 : i64} {
  func.func @kernel(%arg0: i32, %arg1: i32, %arg2: memref<5x512xf32, #tpu.memory_space<vmem>>, %arg3: memref<8x512xf32, #tpu.memory_space<vmem>>, %arg4: memref<8x512xf32, #tpu.memory_space<vmem>>) attributes {dimension_semantics = [#tpu.dimension_semantics<parallel>, #tpu.dimension_semantics<parallel>], iteration_bounds = array<i64: 1, 1>, scalar_prefetch = 0 : i64, scratch_operands = 0 : i64, tpu.core_type = #tpu.core_type<tc>, window_params = [{transform_indices = @transform_0, window_bounds = array<i64: 5, 512>}, {transform_indices = @transform_1, window_bounds = array<i64: 8, 512>}, {transform_indices = @transform_2, window_bounds = array<i64: 8, 512>}]} {
    %c0 = arith.constant 0 : index
    %c0_0 = arith.constant 0 : index
    %0 = vector.load %arg3[%c0, %c0_0] : memref<8x512xf32, #tpu.memory_space<vmem>>, vector<8x512xf32>
    %c0_1 = arith.constant 0 : index
    %c0_2 = arith.constant 0 : index
    %1 = vector.load %arg2[%c0_1, %c0_2] : memref<5x512xf32, #tpu.memory_space<vmem>>, vector<5x512xf32>
    %2 = vector.extract_strided_slice %1 {offsets = [0, 0], sizes = [1, 512], strides = [1, 1]} : vector<5x512xf32> to vector<1x512xf32>
    %3 = vector.broadcast %2 : vector<1x512xf32> to vector<8x512xf32>
    %4 = arith.mulf %3, %0 : vector<8x512xf32>
    %c32_i32 = arith.constant 32 : i32
    %5 = tpu.dynamic_rotate %0 by %c32_i32 dim 1 : vector<8x512xf32>, i32 -> vector<8x512xf32>
    %6 = vector.extract_strided_slice %1 {offsets = [1, 0], sizes = [1, 512], strides = [1, 1]} : vector<5x512xf32> to vector<1x512xf32>
    %7 = vector.broadcast %6 : vector<1x512xf32> to vector<8x512xf32>
    %8 = arith.mulf %7, %5 : vector<8x512xf32>
    %9 = arith.addf %4, %8 : vector<8x512xf32>
    %c480_i32 = arith.constant 480 : i32
    %10 = tpu.dynamic_rotate %0 by %c480_i32 dim 1 : vector<8x512xf32>, i32 -> vector<8x512xf32>
    %11 = vector.extract_strided_slice %1 {offsets = [2, 0], sizes = [1, 512], strides = [1, 1]} : vector<5x512xf32> to vector<1x512xf32>
    %12 = vector.broadcast %11 : vector<1x512xf32> to vector<8x512xf32>
    %13 = arith.mulf %12, %10 : vector<8x512xf32>
    %14 = arith.addf %9, %13 : vector<8x512xf32>
    %c2_i32 = arith.constant 2 : i32
    %15 = tpu.dynamic_rotate %0 by %c2_i32 dim 1 : vector<8x512xf32>, i32 -> vector<8x512xf32>
    %16 = vector.extract_strided_slice %1 {offsets = [3, 0], sizes = [1, 512], strides = [1, 1]} : vector<5x512xf32> to vector<1x512xf32>
    %17 = vector.broadcast %16 : vector<1x512xf32> to vector<8x512xf32>
    %18 = arith.mulf %17, %15 : vector<8x512xf32>
    %19 = arith.addf %14, %18 : vector<8x512xf32>
    %c510_i32 = arith.constant 510 : i32
    %20 = tpu.dynamic_rotate %0 by %c510_i32 dim 1 : vector<8x512xf32>, i32 -> vector<8x512xf32>
    %21 = vector.extract_strided_slice %1 {offsets = [4, 0], sizes = [1, 512], strides = [1, 1]} : vector<5x512xf32> to vector<1x512xf32>
    %22 = vector.broadcast %21 : vector<1x512xf32> to vector<8x512xf32>
    %23 = arith.mulf %22, %20 : vector<8x512xf32>
    %24 = arith.addf %19, %23 : vector<8x512xf32>
    %c0_3 = arith.constant 0 : index
    %c0_4 = arith.constant 0 : index
    %25 = vector.load %arg4[%c0_3, %c0_4] : memref<8x512xf32, #tpu.memory_space<vmem>>, vector<8x512xf32>
    tpu.vector_store %arg4[%c0_3, %c0_4], %24 {strides = array<i32>} : memref<8x512xf32, #tpu.memory_space<vmem>>, vector<8x512xf32>,
    return
  }
  func.func @transform_0(%arg0: i32, %arg1: i32) -> (i32, i32) {
    %c0_i32 = arith.constant 0 : i32
    %c0_i32_0 = arith.constant 0 : i32
    return %c0_i32, %arg0 : i32, i32
  }
  func.func @transform_1(%arg0: i32, %arg1: i32) -> (i32, i32) {
    %c0_i32 = arith.constant 0 : i32
    return %arg1, %arg0 : i32, i32
  }
  func.func @transform_2(%arg0: i32, %arg1: i32) -> (i32, i32) {
    %c0_i32 = arith.constant 0 : i32
    return %arg1, %arg0 : i32, i32
  }
}

module attributes {stable_mosaic.version = 11 : i64} {
  func.func @kernel(%arg0: i32, %arg1: i32, %arg2: memref<3x256xf32, #tpu.memory_space<vmem>>, %arg3: memref<8x256xf32, #tpu.memory_space<vmem>>, %arg4: memref<8x256xf32, #tpu.memory_space<vmem>>) attributes {dimension_semantics = [#tpu.dimension_semantics<parallel>, #tpu.dimension_semantics<parallel>], iteration_bounds = array<i64: 2, 1>, scalar_prefetch = 0 : i64, scratch_operands = 0 : i64, tpu.core_type = #tpu.core_type<tc>, window_params = [{transform_indices = @transform_0, window_bounds = array<i64: 3, 256>}, {transform_indices = @transform_1, window_bounds = array<i64: 8, 256>}, {transform_indices = @transform_2, window_bounds = array<i64: 8, 256>}]} {
    %c0 = arith.constant 0 : index
    %c0_0 = arith.constant 0 : index
    %0 = vector.load %arg3[%c0, %c0_0] : memref<8x256xf32, #tpu.memory_space<vmem>>, vector<8x256xf32>
    %c0_1 = arith.constant 0 : index
    %c0_2 = arith.constant 0 : index
    %1 = vector.load %arg2[%c0_1, %c0_2] : memref<3x256xf32, #tpu.memory_space<vmem>>, vector<3x256xf32>
    %2 = vector.extract_strided_slice %1 {offsets = [0, 0], sizes = [1, 256], strides = [1, 1]} : vector<3x256xf32> to vector<1x256xf32>
    %3 = vector.broadcast %2 : vector<1x256xf32> to vector<8x256xf32>
    %4 = arith.mulf %3, %0 : vector<8x256xf32>
    %c255_i32 = arith.constant 255 : i32
    %5 = tpu.dynamic_rotate %0 by %c255_i32 dim 1 : vector<8x256xf32>, i32 -> vector<8x256xf32>
    %6 = vector.extract_strided_slice %1 {offsets = [1, 0], sizes = [1, 256], strides = [1, 1]} : vector<3x256xf32> to vector<1x256xf32>
    %7 = vector.broadcast %6 : vector<1x256xf32> to vector<8x256xf32>
    %8 = arith.mulf %7, %5 : vector<8x256xf32>
    %9 = arith.addf %4, %8 : vector<8x256xf32>
    %c1_i32 = arith.constant 1 : i32
    %10 = tpu.dynamic_rotate %0 by %c1_i32 dim 1 : vector<8x256xf32>, i32 -> vector<8x256xf32>
    %11 = vector.extract_strided_slice %1 {offsets = [2, 0], sizes = [1, 256], strides = [1, 1]} : vector<3x256xf32> to vector<1x256xf32>
    %12 = vector.broadcast %11 : vector<1x256xf32> to vector<8x256xf32>
    %13 = arith.mulf %12, %10 : vector<8x256xf32>
    %14 = arith.addf %9, %13 : vector<8x256xf32>
    %c0_3 = arith.constant 0 : index
    %c0_4 = arith.constant 0 : index
    %15 = vector.load %arg4[%c0_3, %c0_4] : memref<8x256xf32, #tpu.memory_space<vmem>>, vector<8x256xf32>
    tpu.vector_store %arg4[%c0_3, %c0_4], %14 {strides = array<i32>} : memref<8x256xf32, #tpu.memory_space<vmem>>, vector<8x256xf32>,
    return
  }
  func.func @transform_0(%arg0: i32, %arg1: i32) -> (i32, i32) {
    %c0_i32 = arith.constant 0 : i32
    %c0_i32_0 = arith.constant 0 : i32
    return %c0_i32, %arg0 : i32, i32
  }
  func.func @transform_1(%arg0: i32, %arg1: i32) -> (i32, i32) {
    %c0_i32 = arith.constant 0 : i32
    return %arg1, %arg0 : i32, i32
  }
  func.func @transform_2(%arg0: i32, %arg1: i32) -> (i32, i32) {
    %c0_i32 = arith.constant 0 : i32
    return %arg1, %arg0 : i32, i32
  }
}

</mosaic_0001>

<bundles_post_ra>
// kernel: sharpen_filter_forward.3
= control target key start
LH: loop header
LB: loop body
LE: loop exit
PB: predicated region body
PF: predicated region fallthrough
CT: control target
= control target key end

     0   :  { %s201_s13 = smov 32   ;;  %s202_s18 = smov 96   ;;  %v19_v4 = vlaneseq  ;;  %s328_s1 = inlined_call_operand.vmem [shape: f32[8,512], index: 1, kind: input, shape index: {}]   ;;  %s329_s0 = inlined_call_operand.vmem [shape: f32[5,512], index: 0, kind: input, shape index: {}]   ;;  %s330_s2 = inlined_call_operand.vmem [shape: f32[8,512], index: 2, kind: output, shape index: {}]  }
   0x1   :  { %v13_v0 = vld [vmem:[%s328_s1 + $0x10] sm:$0xff]  ;;  %v11_v1 = vld [vmem:[%s328_s1] sm:$0xff]  ;;  %v14_v2 = vld [vmem:[%s328_s1 + $0x18] sm:$0xff]  ;;  %s203_s19 = smov 2   ;;  %s204_s20 = smov 126  }
   0x2   :  { %43 = vrot.lane.b32.xlu1 %v13_v0, %s201_s13  ;;  %39 = vrot.lane.b32.xlu0 %v11_v1, %s201_s13  ;;  %v12_v3 = vld [vmem:[%s328_s1 + $0x8] sm:$0xff]  ;;  %v20_v7 = vshrl.u32 %v19_v4, 7  ;;  %v235_v11 = vld [vmem:[%s329_s0] sm:$0x1f]  ;;  %v242_v13 = vand.u32 127, %v19_v4 }
   0x3   :  { %v240_v12 = vld [vmem:[%s329_s0 + $0x18] sm:$0x1f]  ;;  %v247_v14 = vld [vmem:[%s329_s0 + $0x8] sm:$0x1f]  ;;  %v252_v15 = vld [vmem:[%s329_s0 + $0x10] sm:$0x1f] }
   0x4   :  { %v21_v10 = vsub.s32 0, %v20_v7  ;;  %v56_v18 = vsub.s32 1, %v20_v7  ;;  %v93_v21 = vsub.s32 2, %v20_v7  ;;  %vm49_vm0 = vcmp.lt.s32.totalorder %v242_v13, 32 }
   0x5   :  { %vm86_vm1 = vcmp.lt.s32.totalorder %v242_v13, 96  ;;  %v130_v26 = vsub.s32 3, %v20_v7  ;;  %vm123_vm2 = vcmp.lt.s32.totalorder %v242_v13, 2  ;;  %v268_v37 = vsub.s32 4, %v20_v7 }
   0x6   :  { %45 = vrot.lane.b32.xlu1 %v14_v2, %s201_s13  ;;  %41 = vrot.lane.b32.xlu0 %v12_v3, %s201_s13  ;;  %v22_v19 = vrot.slane %v235_v11, %v21_v10  ;;  %v34_v20 = vrot.slane %v240_v12, %v21_v10  ;;  %v26_v22 = vrot.slane %v247_v14, %v21_v10  ;;  %vm160_vm3 = vcmp.lt.s32.totalorder %v242_v13, 126 }
   0x7   :  { %v30_v23 = vrot.slane %v252_v15, %v21_v10  ;;  %v57_v27 = vrot.slane %v235_v11, %v56_v18  ;;  %v69_v28 = vrot.slane %v240_v12, %v56_v18  ;;  %v61_v29 = vrot.slane %v247_v14, %v56_v18 }
   0x8   :  { %v35_v30 = vmul.f32 %v22_v19, %v11_v1  ;;  %v38_v31 = vmul.f32 %v34_v20, %v14_v2  ;;  %v65_v32 = vrot.slane %v252_v15, %v56_v18  ;;  %v94_v33 = vrot.slane %v235_v11, %v93_v21 }
   0x9   :  { %v36_v35 = vmul.f32 %v26_v22, %v12_v3  ;;  %v37_v36 = vmul.f32 %v30_v23, %v13_v0  ;;  %v106_v38 = vrot.slane %v240_v12, %v93_v21  ;;  %v98_v39 = vrot.slane %v247_v14, %v93_v21 }
   0xa   :  { %80 = vrot.lane.b32.xlu1 %v12_v3, %s202_s18  ;;  %78 = vrot.lane.b32.xlu0 %v11_v1, %s202_s18  ;;  %v102_v40 = vrot.slane %v252_v15, %v93_v21  ;;  %v135_v43 = vrot.slane %v247_v14, %v130_v26  ;;  %v131_v47 = vrot.slane %v235_v11, %v130_v26 }
   0xb   :  { %v139_v50 = vrot.slane %v252_v15, %v130_v26  ;;  %v143_v51 = vrot.slane %v240_v12, %v130_v26  ;;  %v168_v53 = vrot.slane %v235_v11, %v268_v37  ;;  %v180_v54 = vrot.slane %v240_v12, %v268_v37 }
   0xc   :  { %v172_v7 = vrot.slane %v247_v14, %v268_v37 }
   0xe   :  { %84 = vrot.lane.b32.xlu1 %v14_v2, %s202_s18  ;;  %82 = vrot.lane.b32.xlu0 %v13_v0, %s202_s18 }
  0x12   :  { %117 = vrot.lane.b32.xlu1 %v12_v3, %s203_s19  ;;  %115 = vrot.lane.b32.xlu0 %v11_v1, %s203_s19 }
  0x16   :  { %121 = vrot.lane.b32.xlu1 %v14_v2, %s203_s19  ;;  %119 = vrot.lane.b32.xlu0 %v13_v0, %s203_s19 }
  0x1a   :  { %154 = vrot.lane.b32.xlu1 %v12_v3, %s204_s20  ;;  %152 = vrot.lane.b32.xlu0 %v11_v1, %s204_s20 }
  0x1e   :  { %158 = vrot.lane.b32.xlu1 %v14_v2, %s204_s20  ;;  %156 = vrot.lane.b32.xlu0 %v13_v0, %s204_s20 }
  0x74   :  { %v44_v5 = vpop.permute.xlu1 %43  ;;  %v40_v6 = vpop.permute.xlu0 %39 }
  0x78   :  { %v46_v8 = vpop.permute.xlu1 %45  ;;  %v42_v9 = vpop.permute.xlu0 %41 }
  0x79   :  { %v53_v34 = vsel %vm49_vm0, %v46_v8, %v40_v6  ;;  %v50_v44 = vsel %vm49_vm0, %v44_v5, %v46_v8  ;;  %v52_v45 = vsel %vm49_vm0, %v40_v6, %v42_v9  ;;  %v51_v49 = vsel %vm49_vm0, %v42_v9, %v44_v5 }
  0x7a   :  { %v70_v48 = vmul.f32 %v57_v27, %v53_v34  ;;  %v73_v55 = vmul.f32 %v69_v28, %v50_v44  ;;  %v71_v56 = vmul.f32 %v61_v29, %v52_v45  ;;  %v72_v61 = vmul.f32 %v65_v32, %v51_v49 }
  0x7b   :  { %v176_v8 = vrot.slane %v252_v15, %v268_v37 }
  0x7c   :  { %v81_v16 = vpop.permute.xlu1 %80  ;;  %v79_v17 = vpop.permute.xlu0 %78  ;;  %v74_v1 = vadd.f32 %v70_v48, %v35_v30  ;;  %v75_v9 = vadd.f32 %v71_v56, %v36_v35  ;;  %v77_v18 = vadd.f32 %v73_v55, %v38_v31  ;;  %v76_v19 = vadd.f32 %v72_v61, %v37_v36 }
  0x7d   :  { %v89_v46 = vsel %vm86_vm1, %v79_v17, %v81_v16 }
  0x7e   :  { %v107_v57 = vmul.f32 %v94_v33, %v89_v46 }
  0x80   :  { %v85_v24 = vpop.permute.xlu1 %84  ;;  %v83_v25 = vpop.permute.xlu0 %82  ;;  %v111_v10 = vadd.f32 %v107_v57, %v74_v1 }
  0x81   :  { %v88_v52 = vsel %vm86_vm1, %v81_v16, %v83_v25  ;;  %v87_v58 = vsel %vm86_vm1, %v83_v25, %v85_v24  ;;  %v90_v62 = vsel %vm86_vm1, %v85_v24, %v79_v17 }
  0x82   :  { %v108_v2 = vmul.f32 %v98_v39, %v88_v52  ;;  %v109_v5 = vmul.f32 %v102_v40, %v87_v58  ;;  %v110_v11 = vmul.f32 %v106_v38, %v90_v62 }
  0x84   :  { %v118_v41 = vpop.permute.xlu1 %117  ;;  %v116_v42 = vpop.permute.xlu0 %115  ;;  %v112_v22 = vadd.f32 %v108_v2, %v75_v9  ;;  %v113_v14 = vadd.f32 %v109_v5, %v76_v19  ;;  %v114_v26 = vadd.f32 %v110_v11, %v77_v18 }
  0x85   :  { %v126_v63 = vsel %vm123_vm2, %v116_v42, %v118_v41 }
  0x86   :  { %v145_v12 = vmul.f32 %v135_v43, %v126_v63 }
  0x88   :  { %v122_v59 = vpop.permute.xlu1 %121  ;;  %v120_v60 = vpop.permute.xlu0 %119  ;;  %v149_v27 = vadd.f32 %v145_v12, %v112_v22 }
  0x89   :  { %v127_v0 = vsel %vm123_vm2, %v122_v59, %v116_v42  ;;  %v125_v4 = vsel %vm123_vm2, %v118_v41, %v120_v60  ;;  %v124_v6 = vsel %vm123_vm2, %v120_v60, %v122_v59 }
  0x8a   :  { %v144_v3 = vmul.f32 %v131_v47, %v127_v0  ;;  %v146_v20 = vmul.f32 %v139_v50, %v125_v4  ;;  %v147_v24 = vmul.f32 %v143_v51, %v124_v6 }
  0x8c   :  { %v155_v16 = vpop.permute.xlu1 %154  ;;  %v153_v17 = vpop.permute.xlu0 %152  ;;  %v148_v23 = vadd.f32 %v144_v3, %v111_v10  ;;  %v150_v30 = vadd.f32 %v146_v20, %v113_v14  ;;  %v151_v34 = vadd.f32 %v147_v24, %v114_v26 }
  0x8d   :  { %v163_v21 = vsel %vm160_vm3, %v153_v17, %v155_v16 }
  0x8e   :  { %v181_v25 = vmul.f32 %v168_v53, %v163_v21 }
  0x90   :  { %v185_v15 = vadd.f32 %v181_v25, %v148_v23  ;;  %v159_v28 = vpop.permute.xlu1 %158  ;;  %v157_v29 = vpop.permute.xlu0 %156 }
  0x91   :  { %v164_v32 = vsel %vm160_vm3, %v159_v28, %v153_v17  ;;  %v161_v31 = vsel %vm160_vm3, %v157_v29, %v159_v28  ;;  %v162_v33 = vsel %vm160_vm3, %v155_v16, %v157_v29 }
  0x92   :  { %189 = vst [vmem:[%s330_s2] sm:$0xff] %v185_v15  ;;  %v184_v35 = vmul.f32 %v180_v54, %v164_v32  ;;  %v182_v36 = vmul.f32 %v172_v7, %v162_v33  ;;  %v183_v37 = vmul.f32 %v176_v8, %v161_v31 }
  0x94   :  { %v188_v38 = vadd.f32 %v184_v35, %v151_v34  ;;  %v186_v39 = vadd.f32 %v182_v36, %v149_v27  ;;  %v187_v40 = vadd.f32 %v183_v37, %v150_v30 }
  0x96   :  { %192 = vst [vmem:[%s330_s2 + $0x18] sm:$0xff] %v188_v38  ;;  %190 = vst [vmem:[%s330_s2 + $0x8] sm:$0xff] %v186_v39 }
  0x97   :  { %191 = vst [vmem:[%s330_s2 + $0x10] sm:$0xff] %v187_v40 }

// kernel: neg.7
= control target key start
LH: loop header
LB: loop body
LE: loop exit
PB: predicated region body
PF: predicated region fallthrough
CT: control target
= control target key end

     0   :  { %s40_s0 = inlined_call_operand.vmem [shape: f32[256,1], index: 0, kind: input, shape index: {}]   ;;  %s41_s1 = inlined_call_operand.vmem [shape: f32[256,1], index: 1, kind: output, shape index: {}]  }
   0x1   :  { %v2_v0 = vld [vmem:[%s40_s0] sm:$0x1]  ;;  %v16_v1 = vld [vmem:[%s40_s0 + $0x1] sm:$0x1] }
   0x2   :  { %v5_v2 = vxor.u32 2147483648, %v2_v0  ;;  %v12_v3 = vxor.u32 2147483648, %v16_v1 }
   0x4   :  { %7 = vst [vmem:[%s41_s1] sm:$0x1] %v5_v2  ;;  %17 = vst [vmem:[%s41_s1 + $0x1] sm:$0x1] %v12_v3 }

// kernel: sharpen_filter_forward.2
= control target key start
LH: loop header
LB: loop body
LE: loop exit
PB: predicated region body
PF: predicated region fallthrough
CT: control target
= control target key end

     0   :  { %s470_s9 = smov 0   ;;  %s472_s10 = smov 0   ;;  %s514_s0 = inlined_call_operand.vmem [shape: f32[3,512], index: 0, kind: input, shape index: {}]   ;;  %s515_s1 = inlined_call_operand.vmem [shape: f32[8,512], index: 1, kind: input, shape index: {}]   ;;  %s516_s2 = inlined_call_operand.vmem [shape: f32[8,512], index: 2, kind: output, shape index: {}]  }
   0x1   :  { %s474_s11 = smov 0  }
   0x2 LB: > { %s24_s12 = sadd.s32 1, %s447_s10  ;;  %p394_p0 = scmp.ge.s32.totalorder %s451_s11, 1  ;;  %s451_s11 = sphi %s474_s11, %s12_s11   ;;  %s447_s10 = sphi %s472_s10, %s518_s10   ;;  %s443_s9 = sphi %s470_s9, %s517_s9  }
   0x3   : > { %p26_p1 = scmp.ge.s32.totalorder %s24_s12, 2  ;;  %p144_p2 = scmp.lt.s32.totalorder %s451_s11, 3 }
   0x5   : > { %s520_s12 = smov (%p26_p1, %s24_s12), 0  ;;  %p145_p3 = pnand %p394_p0, %p144_p2 }
   0x6   : > { %s395_s13 = sshll.u32 (!%p145_p3), %s443_s9, 1  ;;  %v209_v0 = vlaneseq (!%p145_p3)  ;;  %s453_s22 = smov (!%p145_p3), 1  }
   0x7   : > { %148 = sbr.rel (%p145_p3) target bundleno = 145 (0x91), region = 28  ;;  %p180_p4 = scmp.lt.s32.totalorder (!%p145_p3), %s395_s13, 3 }
   0x8   : > { %v210_v1 = vshrl.u32 (!%p145_p3), %v209_v0, 7  ;;  %s454_s23 = smov (!%p145_p3), 127   ;;  %v234_v17 = vand.u32 (!%p145_p3), 127, %v209_v0 }
   0xa   : > { %v211_v2 = vsub.s32 (!%p145_p3), 0, %v210_v1  ;;  %v215_v3 = vsub.s32 (!%p145_p3), 4, %v210_v1  ;;  %v240_v13 = vsub.s32 (!%p145_p3), 1, %v210_v1  ;;  %v244_v14 = vsub.s32 (!%p145_p3), 5, %v210_v1 }
   0xb   : > { %v269_v15 = vsub.s32 (!%p145_p3), 2, %v210_v1  ;;  %v273_v16 = vsub.s32 (!%p145_p3), 6, %v210_v1  ;;  %vm264_vm0 = vcmp.lt.s32.totalorder (!%p145_p3), %v234_v17, 1  ;;  %vm235_vm1 = vcmp.lt.s32.totalorder (!%p145_p3), %v234_v17, 127 }
   0xe   : > { %s522_s13 = smov (!%p180_p4, %s395_s13), 3 }
   0xf   : > { %s398_s14 = sshll.u32 %s522_s13, 3  ;;  %s396_s15 = sshll.u32 %s522_s13, 2 }
  0x10   : > { %s193_s18 = scalar_lea.vmem %s515_s1, %s398_s14  ;;  %s183_s21 = scalar_lea.vmem %s514_s0, %s396_s15 }
  0x11   : > { %v205_v4 = vld [vmem:[%s193_s18] sm:$0xff]  ;;  %v206_v7 = vld [vmem:[%s193_s18 + $0x8] sm:$0xff]  ;;  %s203_s26 = scalar_lea.vmem %s516_s2, %s398_s14 }
  0x12   : > { %260 = vrot.lane.b32.xlu1 %v205_v4, %s453_s22  ;;  %v207_v5 = vld [vmem:[%s183_s21] sm:$0x77]  ;;  %229 = vrot.lane.b32.xlu0 %v205_v4, %s454_s23 }
  0x13   : > { %v212_v6 = vrot.slane %v207_v5, %v211_v2  ;;  %v216_v8 = vrot.slane %v207_v5, %v215_v3  ;;  %v241_v18 = vrot.slane %v207_v5, %v240_v13  ;;  %v245_v19 = vrot.slane %v207_v5, %v244_v14 }
  0x14   : > { %v270_v22 = vrot.slane %v207_v5, %v269_v15  ;;  %v274_v23 = vrot.slane %v207_v5, %v273_v16 }
  0x15   : > { %v222_v9 = vrot.slane %v212_v6, %v211_v2  ;;  %v226_v10 = vrot.slane %v216_v8, %v211_v2  ;;  %v251_v24 = vrot.slane %v241_v18, %v240_v13  ;;  %v255_v25 = vrot.slane %v245_v19, %v240_v13 }
  0x16   : > { %262 = vrot.lane.b32.xlu1 %v206_v7, %s453_s22  ;;  %231 = vrot.lane.b32.xlu0 %v206_v7, %s454_s23  ;;  %v280_v27 = vrot.slane %v270_v22, %v269_v15  ;;  %v284_v28 = vrot.slane %v274_v23, %v269_v15 }
  0x17   : > { %v227_v11 = vmul.f32 %v222_v9, %v205_v4  ;;  %v228_v12 = vmul.f32 %v226_v10, %v206_v7 }
  0x84   : > { %v261_v20 = vpop.permute.xlu1 %260  ;;  %v230_v21 = vpop.permute.xlu0 %229 }
  0x88   : > { %v263_v26 = vpop.permute.xlu1 %262  ;;  %v232_v29 = vpop.permute.xlu0 %231 }
  0x89   : > { %v265_v30 = vsel %vm264_vm0, %v261_v20, %v263_v26  ;;  %v266_v31 = vsel %vm264_vm0, %v263_v26, %v261_v20  ;;  %v236_v32 = vsel %vm235_vm1, %v230_v21, %v232_v29  ;;  %v237_v33 = vsel %vm235_vm1, %v232_v29, %v230_v21 }
  0x8a   : > { %v256_v34 = vmul.f32 %v251_v24, %v236_v32  ;;  %v257_v35 = vmul.f32 %v255_v25, %v237_v33  ;;  %v285_v36 = vmul.f32 %v280_v27, %v266_v31  ;;  %v286_v37 = vmul.f32 %v284_v28, %v265_v30 }
  0x8c   : > { %v258_v38 = vadd.f32 %v256_v34, %v227_v11  ;;  %v259_v39 = vadd.f32 %v257_v35, %v228_v12 }
  0x8e   : > { %v287_v40 = vadd.f32 %v285_v36, %v258_v38  ;;  %v288_v41 = vadd.f32 %v286_v37, %v259_v39 }
  0x90   : > { %289 = vst [vmem:[%s203_s26] sm:$0xff] %v287_v40  ;;  %290 = vst [vmem:[%s203_s26 + $0x8] sm:$0xff] %v288_v41 }
  0x91 PF: > { %s12_s11 = sadd.s32 1, %s451_s11   ;;  %s517_s9 = smov %s447_s10 }
  0x92   : > { %p9_p5 = scmp.ge.s32.totalorder %s12_s11, 4   ;;  %s518_s10 = smov %s520_s12 }
  0x94   :  { %11 = sbr.rel (!%p9_p5) target bundleno = 2 (0x2), region = 61 }

</bundles_post_ra>
